<compile_context>
chip_gen: v7x
topology: tpu7x:2x2x1
jax: 0.10.0
libtpu: 0.0.40
codegen_flags: <defaults>
</compile_context>

<pallas_src>
import jax
import jax.numpy as jnp
from jax.experimental import pallas as pl
from jax.experimental.pallas import tpu as pltpu

EPS = 1e-5


def _banded_weights(w, Wd, C):
    """PyTorch conv weight (Cout, Cin, 3, 3) -> (3*Wd*C, Wd*C) bf16 stacked
    banded matrices.

    For tap kh: mats_kh[wi*C + ci, wo*C + co] = w[co, ci, kh, kw] with
    wi = wo + kw - 1, so `row_slab(h+kh) @ mats_kh`, summed over kh, is the
    3x3 conv; truncating the band at wi outside [0, Wd) implements the W
    zero-padding.  The three kh mats are stacked along the contraction axis
    so a single K=3*Wd*C matmul does the whole conv.
    """
    mats = []
    for kh in range(3):
        a = jnp.zeros((Wd * C, Wd * C), jnp.float32)
        for kw in range(3):
            tap = jnp.transpose(w[:, :, kh, kw])               # (Cin, Cout)
            a = a + jnp.kron(jnp.eye(Wd, k=1 - kw, dtype=jnp.float32), tap)
        mats.append(a)
    return jnp.concatenate(mats, axis=0).astype(jnp.bfloat16)  # (3*Wd*C, Wd*C)


def _make_kernel(N, H, W, C):
    L = W * C                       # lane width (multiple of 128)
    M2 = N * H                      # output rows in slab layout
    inv_cnt = 1.0 / float(N * H * W)

    def kernel(x_ref, w1_ref, w2_ref, gb_ref, grp_ref, o_ref, pad_ref):
        # x_ref:   (N, H, L)    bf16 unpadded input slab
        # w*_ref:  (3L, L)      bf16 stacked banded conv weights
        # gb_ref:  (4, L)       f32 rows: [gamma1, beta1, gamma2, beta2]
        # grp_ref: (L, L)       f32 channel-group matrix (1 iff i%C == j%C)
        # o_ref:   (N*H, L)     f32 lane-dense output slab
        # pad_ref: (N, H+2, L)  bf16 scratch, H-halo-padded conv input

        # ---- H-pad inside the kernel: zero ONLY the halo rows ----
        zrow = jnp.zeros((N, 1, L), jnp.bfloat16)
        pad_ref[:, 0:1, :] = zrow
        pad_ref[:, H + 1:H + 2, :] = zrow
        pad_ref[:, 1:H + 1, :] = x_ref[...]

        def conv3x3(w_ref):
            # One fused K=3L bf16 matmul: kh taps stacked on the contraction
            # axis so the MXU accumulates them internally.
            lhs = jnp.concatenate(
                [pad_ref[:, kh:kh + H, :].reshape(M2, L) for kh in range(3)],
                axis=-1)                                   # (M2, 3L) bf16
            return jnp.dot(lhs, w_ref[...],
                           preferred_element_type=jnp.float32)

        def bn_affine(acc, g, b):
            # Two-pass (centered) batch statistics; per-channel totals via a
            # small f32 MXU matmul against the channel-group matrix.
            rowsum = jnp.sum(acc, axis=0, keepdims=True)           # (1, L)
            mean = jnp.dot(rowsum, grp_ref[...],
                           preferred_element_type=jnp.float32) * inv_cnt
            d = acc - mean
            rowsq = jnp.sum(d * d, axis=0, keepdims=True)          # (1, L)
            var = jnp.dot(rowsq, grp_ref[...],
                          preferred_element_type=jnp.float32) * inv_cnt
            scale = g * jax.lax.rsqrt(var + EPS)
            return d * scale + b

        g1 = gb_ref[0:1, :]
        b1 = gb_ref[1:2, :]
        g2 = gb_ref[2:3, :]
        b2 = gb_ref[3:4, :]

        # ---- conv1 -> bn1 -> silu1 ----
        y1 = bn_affine(conv3x3(w1_ref), g1, b1)
        y1 = y1 * jax.nn.sigmoid(y1)

        # Reuse the padded scratch for conv2's input (halo rows stay zero).
        pad_ref[:, 1:H + 1, :] = y1.reshape(N, H, L).astype(jnp.bfloat16)

        # ---- conv2 -> bn2 -> dropout(p=0)=Identity -> +identity -> silu2 ----
        y2 = bn_affine(conv3x3(w2_ref), g2, b2)
        identity = x_ref[...].reshape(M2, L).astype(jnp.float32)
        out = y2 + identity
        o_ref[...] = out * jax.nn.sigmoid(out)          # dense (M2, 128) store

    return kernel


def fractal_residual_unit(x_nchw, w1, w2, g1, b1, g2, b2):
    """x_nchw: (N, C, H, W) f32; conv weights in PyTorch layout (Cout, Cin, 3, 3)."""
    N, C, H, W = x_nchw.shape
    L = W * C
    M2 = N * H
    assert L % 128 == 0, "lane-dense layout requires W*C to be a multiple of 128"

    # NCHW -> lane-dense (N, H, W*C) slab, DMA'd as bf16 (matmul path is bf16).
    x_slab = (jnp.transpose(x_nchw, (0, 2, 3, 1))
              .reshape(N, H, L).astype(jnp.bfloat16))

    w1b = _banded_weights(w1, W, C)                                # (3L, L)
    w2b = _banded_weights(w2, W, C)

    # Pack all BN affine params into ONE (4, L) input (single small DMA).
    gb = jnp.stack([jnp.tile(p.astype(jnp.float32), W)
                    for p in (g1, b1, g2, b2)])                    # (4, L)

    # Channel-group reduction matrix: grp[i, j] = 1 iff i % C == j % C.
    lane = jnp.arange(L, dtype=jnp.int32)
    grp = (lane[:, None] % C == lane[None, :] % C).astype(jnp.float32)

    flops = 2 * 2 * M2 * (3 * L) * L            # two fused K=3L conv matmuls
    bytes_accessed = (N * H * L * 2            # bf16 input slab
                      + M2 * L * 4             # f32 output slab
                      + 2 * (3 * L) * L * 2    # two bf16 weight stacks
                      + L * L * 4 + 4 * L * 4)  # grp matrix + packed BN params

    vmem = pl.BlockSpec(memory_space=pltpu.MemorySpace.VMEM)
    out_slab = pl.pallas_call(
        _make_kernel(N, H, W, C),
        out_shape=jax.ShapeDtypeStruct((M2, L), jnp.float32),
        in_specs=[vmem] * 5,
        out_specs=vmem,
        scratch_shapes=[pltpu.VMEM((N, H + 2, L), jnp.bfloat16)],
        compiler_params=pltpu.CompilerParams(vmem_limit_bytes=32 * 1024 * 1024),
        cost_estimate=pl.CostEstimate(flops=flops,
                                      transcendentals=2 * M2 * L,
                                      bytes_accessed=bytes_accessed),
    )(x_slab, w1b, w2b, gb, grp)

    return jnp.transpose(out_slab.reshape(N, H, W, C), (0, 3, 1, 2))  # -> NCHW


def _reference(x_nchw, w1, w2, g1, b1, g2, b2):
    """Pure-JAX f32 reference matching the PyTorch training-mode forward."""
    x = jnp.transpose(x_nchw, (0, 2, 3, 1))

    def conv(h, w):
        return jax.lax.conv_general_dilated(
            h, jnp.transpose(w, (2, 3, 1, 0)), (1, 1), ((1, 1), (1, 1)),
            dimension_numbers=("NHWC", "HWIO", "NHWC"))

    def bn(h, g, b):
        m = jnp.mean(h, axis=(0, 1, 2), keepdims=True)
        v = jnp.mean((h - m) ** 2, axis=(0, 1, 2), keepdims=True)
        return (h - m) / jnp.sqrt(v + EPS) * g + b

    out = conv(x, w1)
    out = bn(out, g1, b1)
    out = out * jax.nn.sigmoid(out)
    out = conv(out, w2)
    out = bn(out, g2, b2)
    out = out + x
    out = out * jax.nn.sigmoid(out)
    return jnp.transpose(out, (0, 3, 1, 2))


if __name__ == "__main__":
    N, C, H, W = 2, 8, 16, 16        # W*C = 128 -> one dense lane group
    key = jax.random.PRNGKey(0)
    ks = jax.random.split(key, 7)
    x = jax.random.normal(ks[0], (N, C, H, W), jnp.float32)
    w1 = 0.1 * jax.random.normal(ks[1], (C, C, 3, 3), jnp.float32)
    w2 = 0.1 * jax.random.normal(ks[2], (C, C, 3, 3), jnp.float32)
    g1 = 1.0 + 0.1 * jax.random.normal(ks[3], (C,), jnp.float32)
    b1 = 0.1 * jax.random.normal(ks[4], (C,), jnp.float32)
    g2 = 1.0 + 0.1 * jax.random.normal(ks[5], (C,), jnp.float32)
    b2 = 0.1 * jax.random.normal(ks[6], (C,), jnp.float32)

    out = jax.block_until_ready(fractal_residual_unit(x, w1, w2, g1, b1, g2, b2))
    ref = _reference(x, w1, w2, g1, b1, g2, b2)
    err = float(jnp.max(jnp.abs(out - ref)))
    # bf16 input/weights/intermediate (f32 MXU accumulation) vs pure-f32
    # reference -> loosened tolerance; structural bugs would be O(1) errors.
    assert jnp.allclose(out, ref, atol=5e-2, rtol=5e-2), f"max abs err {err}"
    print("KERNEL_OK")
</pallas_src>

<mosaic_0001>
module attributes {stable_mosaic.version = 11 : i64} {
  func.func @kernel(%arg0: memref<2x16x128xbf16, #tpu.memory_space<vmem>>, %arg1: memref<384x128xbf16, #tpu.memory_space<vmem>>, %arg2: memref<384x128xbf16, #tpu.memory_space<vmem>>, %arg3: memref<4x128xf32, #tpu.memory_space<vmem>>, %arg4: memref<128x128xf32, #tpu.memory_space<vmem>>, %arg5: memref<32x128xf32, #tpu.memory_space<vmem>>, %arg6: memref<2x18x128xbf16, #tpu.memory_space<vmem>>) attributes {dimension_semantics = [], scalar_prefetch = 0 : i64, scratch_operands = 1 : i64, tpu.core_type = #tpu.core_type<tc>} {
    %cst = arith.constant 0.000000e+00 : bf16
    %0 = vector.broadcast %cst : bf16 to vector<2x1x128xbf16>
    %c0 = arith.constant 0 : index
    %c0_0 = arith.constant 0 : index
    %c0_1 = arith.constant 0 : index
    %1 = vector.load %arg6[%c0, %c0_0, %c0_1] : memref<2x18x128xbf16, #tpu.memory_space<vmem>>, vector<2x1x128xbf16>
    tpu.vector_store %arg6[%c0, %c0_0, %c0_1], %0 {strides = array<i32>} : memref<2x18x128xbf16, #tpu.memory_space<vmem>>, vector<2x1x128xbf16>,
    %c0_2 = arith.constant 0 : index
    %c17 = arith.constant 17 : index
    %c0_3 = arith.constant 0 : index
    %2 = vector.load %arg6[%c0_2, %c17, %c0_3] : memref<2x18x128xbf16, #tpu.memory_space<vmem>>, vector<2x1x128xbf16>
    tpu.vector_store %arg6[%c0_2, %c17, %c0_3], %0 {strides = array<i32>} : memref<2x18x128xbf16, #tpu.memory_space<vmem>>, vector<2x1x128xbf16>,
    %c0_4 = arith.constant 0 : index
    %c0_5 = arith.constant 0 : index
    %c0_6 = arith.constant 0 : index
    %3 = vector.load %arg0[%c0_4, %c0_5, %c0_6] : memref<2x16x128xbf16, #tpu.memory_space<vmem>>, vector<2x16x128xbf16>
    %c0_7 = arith.constant 0 : index
    %c1 = arith.constant 1 : index
    %c0_8 = arith.constant 0 : index
    %4 = vector.load %arg6[%c0_7, %c1, %c0_8] : memref<2x18x128xbf16, #tpu.memory_space<vmem>>, vector<2x16x128xbf16>
    tpu.vector_store %arg6[%c0_7, %c1, %c0_8], %3 {strides = array<i32>} : memref<2x18x128xbf16, #tpu.memory_space<vmem>>, vector<2x16x128xbf16>,
    %c0_9 = arith.constant 0 : index
    %c0_10 = arith.constant 0 : index
    %5 = vector.load %arg3[%c0_9, %c0_10] : memref<4x128xf32, #tpu.memory_space<vmem>>, vector<1x128xf32>
    %c1_11 = arith.constant 1 : index
    %c0_12 = arith.constant 0 : index
    %6 = vector.load %arg3[%c1_11, %c0_12] : memref<4x128xf32, #tpu.memory_space<vmem>>, vector<1x128xf32>
    %c2 = arith.constant 2 : index
    %c0_13 = arith.constant 0 : index
    %7 = vector.load %arg3[%c2, %c0_13] : memref<4x128xf32, #tpu.memory_space<vmem>>, vector<1x128xf32>
    %c3 = arith.constant 3 : index
    %c0_14 = arith.constant 0 : index
    %8 = vector.load %arg3[%c3, %c0_14] : memref<4x128xf32, #tpu.memory_space<vmem>>, vector<1x128xf32>
    %c0_15 = arith.constant 0 : index
    %c0_16 = arith.constant 0 : index
    %c0_17 = arith.constant 0 : index
    %9 = vector.load %arg6[%c0_15, %c0_16, %c0_17] : memref<2x18x128xbf16, #tpu.memory_space<vmem>>, vector<2x16x128xbf16>
    %10 = vector.shape_cast %9 : vector<2x16x128xbf16> to vector<32x128xbf16>
    %c0_18 = arith.constant 0 : index
    %c1_19 = arith.constant 1 : index
    %c0_20 = arith.constant 0 : index
    %11 = vector.load %arg6[%c0_18, %c1_19, %c0_20] : memref<2x18x128xbf16, #tpu.memory_space<vmem>>, vector<2x16x128xbf16>
    %12 = vector.shape_cast %11 : vector<2x16x128xbf16> to vector<32x128xbf16>
    %c0_21 = arith.constant 0 : index
    %c2_22 = arith.constant 2 : index
    %c0_23 = arith.constant 0 : index
    %13 = vector.load %arg6[%c0_21, %c2_22, %c0_23] : memref<2x18x128xbf16, #tpu.memory_space<vmem>>, vector<2x16x128xbf16>
    %14 = vector.shape_cast %13 : vector<2x16x128xbf16> to vector<32x128xbf16>
    %15 = tpu.concatenate %10, %12, %14 in 1 : vector<32x128xbf16>, vector<32x128xbf16>, vector<32x128xbf16> -> vector<32x384xbf16>
    %c0_24 = arith.constant 0 : index
    %c0_25 = arith.constant 0 : index
    %16 = vector.load %arg1[%c0_24, %c0_25] : memref<384x128xbf16, #tpu.memory_space<vmem>>, vector<384x128xbf16>
    %cst_26 = arith.constant dense<0.000000e+00> : vector<32x128xf32>
    %17 = tpu.matmul %15, %16, %cst_26 {dimension_numbers = #tpu.dot_dimension_numbers<[1], [0], [0], [1], [0, 0, 1, 1], [], []>} : vector<32x384xbf16>, vector<384x128xbf16>, vector<32x128xf32> -> vector<32x128xf32>
    %cst_27 = arith.constant dense<0.000000e+00> : vector<128xf32>
    %18 = vector.multi_reduction <add>, %17, %cst_27 [0] : vector<32x128xf32> to vector<128xf32>
    %19 = vector.shape_cast %18 : vector<128xf32> to vector<1x128xf32>
    %c0_28 = arith.constant 0 : index
    %c0_29 = arith.constant 0 : index
    %20 = vector.load %arg4[%c0_28, %c0_29] : memref<128x128xf32, #tpu.memory_space<vmem>>, vector<128x128xf32>
    %cst_30 = arith.constant dense<0.000000e+00> : vector<1x128xf32>
    %21 = tpu.matmul %19, %20, %cst_30 {dimension_numbers = #tpu.dot_dimension_numbers<[1], [0], [0], [1], [0, 0, 1, 1], [], []>} : vector<1x128xf32>, vector<128x128xf32>, vector<1x128xf32> -> vector<1x128xf32>
    %cst_31 = arith.constant 0.001953125 : f32
    %22 = vector.broadcast %cst_31 : f32 to vector<1x128xf32>
    %23 = arith.mulf %21, %22 : vector<1x128xf32>
    %24 = vector.broadcast %23 : vector<1x128xf32> to vector<32x128xf32>
    %25 = arith.subf %17, %24 : vector<32x128xf32>
    %26 = arith.mulf %25, %25 : vector<32x128xf32>
    %cst_32 = arith.constant dense<0.000000e+00> : vector<128xf32>
    %27 = vector.multi_reduction <add>, %26, %cst_32 [0] : vector<32x128xf32> to vector<128xf32>
    %28 = vector.shape_cast %27 : vector<128xf32> to vector<1x128xf32>
    %c0_33 = arith.constant 0 : index
    %c0_34 = arith.constant 0 : index
    %29 = vector.load %arg4[%c0_33, %c0_34] : memref<128x128xf32, #tpu.memory_space<vmem>>, vector<128x128xf32>
    %cst_35 = arith.constant dense<0.000000e+00> : vector<1x128xf32>
    %30 = tpu.matmul %28, %29, %cst_35 {dimension_numbers = #tpu.dot_dimension_numbers<[1], [0], [0], [1], [0, 0, 1, 1], [], []>} : vector<1x128xf32>, vector<128x128xf32>, vector<1x128xf32> -> vector<1x128xf32>
    %cst_36 = arith.constant 0.001953125 : f32
    %31 = vector.broadcast %cst_36 : f32 to vector<1x128xf32>
    %32 = arith.mulf %30, %31 : vector<1x128xf32>
    %cst_37 = arith.constant 9.99999974E-6 : f32
    %33 = vector.broadcast %cst_37 : f32 to vector<1x128xf32>
    %34 = arith.addf %32, %33 : vector<1x128xf32>
    %35 = math.rsqrt %34 : vector<1x128xf32>
    %36 = arith.mulf %5, %35 : vector<1x128xf32>
    %37 = vector.broadcast %36 : vector<1x128xf32> to vector<32x128xf32>
    %38 = arith.mulf %25, %37 : vector<32x128xf32>
    %39 = vector.broadcast %6 : vector<1x128xf32> to vector<32x128xf32>
    %40 = arith.addf %38, %39 : vector<32x128xf32>
    %41 = arith.negf %40 : vector<32x128xf32>
    %42 = math.exp %41 : vector<32x128xf32>
    %cst_38 = arith.constant 1.000000e+00 : f32
    %43 = vector.broadcast %cst_38 : f32 to vector<32x128xf32>
    %44 = arith.addf %43, %42 : vector<32x128xf32>
    %45 = arith.divf %43, %44 : vector<32x128xf32>
    %46 = arith.mulf %40, %45 : vector<32x128xf32>
    %47 = vector.shape_cast %46 : vector<32x128xf32> to vector<2x16x128xf32>
    %48 = arith.truncf %47 : vector<2x16x128xf32> to vector<2x16x128xbf16>
    %c0_39 = arith.constant 0 : index
    %c1_40 = arith.constant 1 : index
    %c0_41 = arith.constant 0 : index
    %49 = vector.load %arg6[%c0_39, %c1_40, %c0_41] : memref<2x18x128xbf16, #tpu.memory_space<vmem>>, vector<2x16x128xbf16>
    tpu.vector_store %arg6[%c0_39, %c1_40, %c0_41], %48 {strides = array<i32>} : memref<2x18x128xbf16, #tpu.memory_space<vmem>>, vector<2x16x128xbf16>,
    %c0_42 = arith.constant 0 : index
    %c0_43 = arith.constant 0 : index
    %c0_44 = arith.constant 0 : index
    %50 = vector.load %arg6[%c0_42, %c0_43, %c0_44] : memref<2x18x128xbf16, #tpu.memory_space<vmem>>, vector<2x16x128xbf16>
    %51 = vector.shape_cast %50 : vector<2x16x128xbf16> to vector<32x128xbf16>
    %c0_45 = arith.constant 0 : index
    %c1_46 = arith.constant 1 : index
    %c0_47 = arith.constant 0 : index
    %52 = vector.load %arg6[%c0_45, %c1_46, %c0_47] : memref<2x18x128xbf16, #tpu.memory_space<vmem>>, vector<2x16x128xbf16>
    %53 = vector.shape_cast %52 : vector<2x16x128xbf16> to vector<32x128xbf16>
    %c0_48 = arith.constant 0 : index
    %c2_49 = arith.constant 2 : index
    %c0_50 = arith.constant 0 : index
    %54 = vector.load %arg6[%c0_48, %c2_49, %c0_50] : memref<2x18x128xbf16, #tpu.memory_space<vmem>>, vector<2x16x128xbf16>
    %55 = vector.shape_cast %54 : vector<2x16x128xbf16> to vector<32x128xbf16>
    %56 = tpu.concatenate %51, %53, %55 in 1 : vector<32x128xbf16>, vector<32x128xbf16>, vector<32x128xbf16> -> vector<32x384xbf16>
    %c0_51 = arith.constant 0 : index
    %c0_52 = arith.constant 0 : index
    %57 = vector.load %arg2[%c0_51, %c0_52] : memref<384x128xbf16, #tpu.memory_space<vmem>>, vector<384x128xbf16>
    %cst_53 = arith.constant dense<0.000000e+00> : vector<32x128xf32>
    %58 = tpu.matmul %56, %57, %cst_53 {dimension_numbers = #tpu.dot_dimension_numbers<[1], [0], [0], [1], [0, 0, 1, 1], [], []>} : vector<32x384xbf16>, vector<384x128xbf16>, vector<32x128xf32> -> vector<32x128xf32>
    %cst_54 = arith.constant dense<0.000000e+00> : vector<128xf32>
    %59 = vector.multi_reduction <add>, %58, %cst_54 [0] : vector<32x128xf32> to vector<128xf32>
    %60 = vector.shape_cast %59 : vector<128xf32> to vector<1x128xf32>
    %c0_55 = arith.constant 0 : index
    %c0_56 = arith.constant 0 : index
    %61 = vector.load %arg4[%c0_55, %c0_56] : memref<128x128xf32, #tpu.memory_space<vmem>>, vector<128x128xf32>
    %cst_57 = arith.constant dense<0.000000e+00> : vector<1x128xf32>
    %62 = tpu.matmul %60, %61, %cst_57 {dimension_numbers = #tpu.dot_dimension_numbers<[1], [0], [0], [1], [0, 0, 1, 1], [], []>} : vector<1x128xf32>, vector<128x128xf32>, vector<1x128xf32> -> vector<1x128xf32>
    %cst_58 = arith.constant 0.001953125 : f32
    %63 = vector.broadcast %cst_58 : f32 to vector<1x128xf32>
    %64 = arith.mulf %62, %63 : vector<1x128xf32>
    %65 = vector.broadcast %64 : vector<1x128xf32> to vector<32x128xf32>
    %66 = arith.subf %58, %65 : vector<32x128xf32>
    %67 = arith.mulf %66, %66 : vector<32x128xf32>
    %cst_59 = arith.constant dense<0.000000e+00> : vector<128xf32>
    %68 = vector.multi_reduction <add>, %67, %cst_59 [0] : vector<32x128xf32> to vector<128xf32>
    %69 = vector.shape_cast %68 : vector<128xf32> to vector<1x128xf32>
    %c0_60 = arith.constant 0 : index
    %c0_61 = arith.constant 0 : index
    %70 = vector.load %arg4[%c0_60, %c0_61] : memref<128x128xf32, #tpu.memory_space<vmem>>, vector<128x128xf32>
    %cst_62 = arith.constant dense<0.000000e+00> : vector<1x128xf32>
    %71 = tpu.matmul %69, %70, %cst_62 {dimension_numbers = #tpu.dot_dimension_numbers<[1], [0], [0], [1], [0, 0, 1, 1], [], []>} : vector<1x128xf32>, vector<128x128xf32>, vector<1x128xf32> -> vector<1x128xf32>
    %cst_63 = arith.constant 0.001953125 : f32
    %72 = vector.broadcast %cst_63 : f32 to vector<1x128xf32>
    %73 = arith.mulf %71, %72 : vector<1x128xf32>
    %cst_64 = arith.constant 9.99999974E-6 : f32
    %74 = vector.broadcast %cst_64 : f32 to vector<1x128xf32>
    %75 = arith.addf %73, %74 : vector<1x128xf32>
    %76 = math.rsqrt %75 : vector<1x128xf32>
    %77 = arith.mulf %7, %76 : vector<1x128xf32>
    %78 = vector.broadcast %77 : vector<1x128xf32> to vector<32x128xf32>
    %79 = arith.mulf %66, %78 : vector<32x128xf32>
    %80 = vector.broadcast %8 : vector<1x128xf32> to vector<32x128xf32>
    %81 = arith.addf %79, %80 : vector<32x128xf32>
    %c0_65 = arith.constant 0 : index
    %c0_66 = arith.constant 0 : index
    %c0_67 = arith.constant 0 : index
    %82 = vector.load %arg0[%c0_65, %c0_66, %c0_67] : memref<2x16x128xbf16, #tpu.memory_space<vmem>>, vector<2x16x128xbf16>
    %83 = vector.shape_cast %82 : vector<2x16x128xbf16> to vector<32x128xbf16>
    %84 = arith.extf %83 : vector<32x128xbf16> to vector<32x128xf32>
    %85 = arith.addf %81, %84 : vector<32x128xf32>
    %86 = arith.negf %85 : vector<32x128xf32>
    %87 = math.exp %86 : vector<32x128xf32>
    %cst_68 = arith.constant 1.000000e+00 : f32
    %88 = vector.broadcast %cst_68 : f32 to vector<32x128xf32>
    %89 = arith.addf %88, %87 : vector<32x128xf32>
    %90 = arith.divf %88, %89 : vector<32x128xf32>
    %91 = arith.mulf %85, %90 : vector<32x128xf32>
    %c0_69 = arith.constant 0 : index
    %c0_70 = arith.constant 0 : index
    %92 = vector.load %arg5[%c0_69, %c0_70] : memref<32x128xf32, #tpu.memory_space<vmem>>, vector<32x128xf32>
    tpu.vector_store %arg5[%c0_69, %c0_70], %91 {strides = array<i32>} : memref<32x128xf32, #tpu.memory_space<vmem>>, vector<32x128xf32>,
    return
  }
}

</mosaic_0001>

<bundles_post_ra>
// kernel: tpu_custom_call.1
= control target key start
LH: loop header
LB: loop body
LE: loop exit
PB: predicated region body
PF: predicated region fallthrough
CT: control target
= control target key end

     0   :  { %10 = vsyncpa [#allocation4], 0  ;;  %s2616_s0 = inlined_call_operand.hbm [shape: bf16[2,16,128], index: 0, kind: input, shape index: {}]   ;;  %s2617_s1 = inlined_call_operand.hbm [shape: bf16[384,128], index: 1, kind: input, shape index: {}]   ;;  %s2618_s2 = inlined_call_operand.hbm [shape: bf16[384,128], index: 2, kind: input, shape index: {}]   ;;  %s2619_s3 = inlined_call_operand.vmem [shape: f32[4,128], index: 3, kind: input, shape index: {}]   ;;  %s2620_s4 = inlined_call_operand.hbm [shape: f32[128,128], index: 4, kind: input, shape index: {}]   ;;  %s2621_s5 = inlined_call_operand.hbm [shape: f32[32,128], index: 5, kind: output, shape index: {}]  }
   0x1   :  { %11 = vsyncpa [#allocation7], 0 }
   0x2   :  { %12 = vsyncpa [#allocation10], 0 }
   0x3   :  { %13 = vsyncpa [#allocation5], 0  ;;  %s2249_s18 = smov [#allocation6]   ;;  %s2250_s20 = smov [#allocation3]  }
   0x4   :  { %s31_s19 = sshll.u32 %s2249_s18, 4  ;;  %s19_s21 = sshll.u32 %s2250_s20, 4  ;;  %s32_s19 = int_to_ptr.vmem [resolvable:$true] %s31_s19  ;;  %s2291_s21 = int_to_ptr.vmem [resolvable:$true] %s19_s21 }
   0x5   :  { %s2131_s24 = scalar_lea.hbm %s2617_s1, 3072 }
   0x6   :  { %p2132_p0 = scmp.ne.s32.totalorder %s2617_s1, %s2131_s24  ;;  %p2135_p1 = scmp.lt.u32.totalorder %s2131_s24, %s2617_s1 }
   0x8   :  { %p2137_p2 = pnand %p2135_p1, %p2132_p0 }
   0xa   :  { %2140 = shalt.err (!%p2137_p2)
}
   0xb   :  { %s2141_s29 = scalar_lea.vmem %s32_s19, 3072  ;;  %p2146_p4 = scmp.lt.s32.totalorder %s32_s19, %s32_s19 }
   0xc   :  { %p2142_p3 = scmp.ne.s32.totalorder %s32_s19, %s2141_s29  ;;  %p2147_p5 = scmp.lt.s32.totalorder %s2141_s29, %s2141_s29 }
   0xe   :  { %p2148_p6 = por %p2147_p5, %p2146_p4 }
  0x10   :  { %p2149_p7 = pnand %p2148_p6, %p2142_p3 }
  0x12   :  { %2152 = shalt.err (!%p2149_p7)
}
  0x13   :  { %s2251_s30 = smov 64   ;;  %s2252_s6 = smov 4  }
  0x14   :  { %37 = dma.hbm_to_vmem [thread:$0]  %s2617_s1, 3072, %s32_s19, [#allocation7], %s2251_s30, %s2251_s30, %s2252_s6  }
  0x15   :  { %s2153_s11 = scalar_lea.hbm %s2616_s0, 256 }
  0x16   :  { %p2154_p8 = scmp.ne.s32.totalorder %s2616_s0, %s2153_s11  ;;  %p2157_p9 = scmp.lt.u32.totalorder %s2153_s11, %s2616_s0 }
  0x18   :  { %p2159_p10 = pnand %p2157_p9, %p2154_p8 }
  0x1a   :  { %2162 = shalt.err (!%p2159_p10)
}
  0x1b   :  { %s2163_s16 = scalar_lea.vmem %s2291_s21, 256  ;;  %p2168_p12 = scmp.lt.s32.totalorder %s2291_s21, %s2291_s21 }
  0x1c   :  { %p2164_p11 = scmp.ne.s32.totalorder %s2291_s21, %s2163_s16  ;;  %p2169_p13 = scmp.lt.s32.totalorder %s2163_s16, %s2163_s16 }
  0x1e   :  { %p2170_p0 = por %p2169_p13, %p2168_p12 }
  0x20   :  { %p2171_p1 = pnand %p2170_p0, %p2164_p11 }
  0x22   :  { %2174 = shalt.err (!%p2171_p1)
}
  0x23   :  { %25 = dma.hbm_to_vmem [thread:$0]  %s2616_s0, 256, %s2291_s21, [#allocation4], %s2251_s30, %s2251_s30, %s2252_s6  }
  0x24   :  { %s2253_s18 = smov [#allocation8]   ;;  %s2254_s20 = smov [#allocation9]  }
  0x25   :  { %s43_s19 = sshll.u32 %s2253_s18, 4  ;;  %s57_s22 = sshll.u32 %s2254_s20, 4  ;;  %s44_s19 = int_to_ptr.vmem [resolvable:$true] %s43_s19  ;;  %s2328_s22 = int_to_ptr.vmem [resolvable:$true] %s57_s22 }
  0x26   :  { %s2175_s25 = scalar_lea.hbm %s2618_s2, 3072 }
  0x27   :  { %p2176_p2 = scmp.ne.s32.totalorder %s2618_s2, %s2175_s25  ;;  %p2179_p3 = scmp.lt.u32.totalorder %s2175_s25, %s2618_s2 }
  0x29   :  { %p2181_p4 = pnand %p2179_p3, %p2176_p2 }
  0x2b   :  { %2184 = shalt.err (!%p2181_p4)
}
  0x2c   :  { %s2185_s0 = scalar_lea.vmem %s44_s19, 3072  ;;  %p2190_p6 = scmp.lt.s32.totalorder %s44_s19, %s44_s19 }
  0x2d   :  { %p2186_p5 = scmp.ne.s32.totalorder %s44_s19, %s2185_s0  ;;  %p2191_p7 = scmp.lt.s32.totalorder %s2185_s0, %s2185_s0 }
  0x2f   :  { %p2192_p8 = por %p2191_p7, %p2190_p6 }
  0x31   :  { %p2193_p9 = pnand %p2192_p8, %p2186_p5 }
  0x33   :  { %2196 = shalt.err (!%p2193_p9)
}
  0x34   :  { %49 = dma.hbm_to_vmem [thread:$0]  %s2618_s2, 3072, %s44_s19, [#allocation7], %s2251_s30, %s2251_s30, %s2252_s6  }
  0x35   :  { %s2197_s10 = scalar_lea.hbm %s2620_s4, 2048 }
  0x36   :  { %p2198_p10 = scmp.ne.s32.totalorder %s2620_s4, %s2197_s10  ;;  %p2201_p11 = scmp.lt.u32.totalorder %s2197_s10, %s2620_s4 }
  0x38   :  { %p2203_p12 = pnand %p2201_p11, %p2198_p10 }
  0x3a   :  { %2206 = shalt.err (!%p2203_p12)
}
  0x3b   :  { %s2207_s15 = scalar_lea.vmem %s2328_s22, 2048  ;;  %p2212_p0 = scmp.lt.s32.totalorder %s2328_s22, %s2328_s22 }
  0x3c   :  { %p2208_p13 = scmp.ne.s32.totalorder %s2328_s22, %s2207_s15  ;;  %p2213_p1 = scmp.lt.s32.totalorder %s2207_s15, %s2207_s15 }
  0x3e   :  { %p2214_p2 = por %p2213_p1, %p2212_p0 }
  0x40   :  { %p2215_p3 = pnand %p2214_p2, %p2208_p13 }
  0x42   :  { %2218 = shalt.err (!%p2215_p3)
}
  0x43   :  { %s2255_s2 = smov 128   ;;  %s2256_s30 = smov 8  }
  0x44   :  { %63 = dma.hbm_to_vmem [thread:$0]  %s2620_s4, 2048, %s2328_s22, [#allocation10], %s2255_s2, %s2255_s2, %s2256_s30  }
  0x45   :  { %2241 = dma.done.wait [#allocation4], 256  }
  0x46   :  { %2242 = vsyncadd [#allocation4], 4294967040 }
  0x47   :  { %2243 = dma.done.wait [#allocation7], 6144  }
  0x48   :  { %2244 = vsyncadd [#allocation7], 4294961152 }
  0x49   :  { %2245 = dma.done.wait [#allocation10], 2048  }
  0x4a   :  { %2246 = vsyncadd [#allocation10], 4294965248  ;;  %v2043_v0 = vld [vmem:[#allocation6 + $0x40] sm:$0xff]   ;;  %v2046_v3 = vld [vmem:[#allocation6 + $0x48] sm:$0xff]   ;;  %vm78_vm0 = vsmask.f32 256 }
  0x4b   :  { %v2044_v1 = vld [vmem:[#allocation6] sm:$0xff]   ;;  %1611 = vmatprep.subr.bf16.mxu0 %v2043_v0  ;;  %v2047_v4 = vld [vmem:[#allocation6 + $0x8] sm:$0xff]   ;;  %v2049_v6 = vld [vmem:[#allocation6 + $0x50] sm:$0xff]   ;;  %vm77_vm1 = vcmask 1040384   ;;  %vm86_vm2 = vsmask.f32 7938 }
  0x4c   :  { %v2045_v2 = vld [vmem:[#allocation6 + $0x80] sm:$0xff]   ;;  %1612 = vmatpush3.bf16.msra.mxu0 %v2044_v1  ;;  %v2048_v5 = vld [vmem:[#allocation6 + $0x88] sm:$0xff]   ;;  %v2050_v7 = vld [vmem:[#allocation6 + $0x10] sm:$0xff]   ;;  %vm98_vm5 = vsmask.f32 4368  ;;  %vm140_vm6 = vcmask 1043456  }
  0x4d   :  { %1755 = vmatprep.subr.bf16.mxu1 %v2045_v2  ;;  %1613 = vmatprep.subr.bf16.mxu0 %v2046_v3  ;;  %v2051_v8 = vld [vmem:[#allocation6 + $0x90] sm:$0xff]   ;;  %v2052_v9 = vld [vmem:[#allocation6 + $0x58] sm:$0xff]   ;;  %v2055_v12 = vld [vmem:[#allocation6 + $0x60] sm:$0xff]   ;;  %vm225_vm9 = vcmask 1042432   ;;  %v2257_v59 = vmov 0.0|0.0   ;;  %vm226_vm10 = vcmask 1046532  }
  0x4e   :  { %1756 = vmatpush3.bf16.msra.mxu1 %v2045_v2  ;;  %v2053_v10 = vld [vmem:[#allocation6 + $0x18] sm:$0xff]   ;;  %v2057_v13 = vld [vmem:[#allocation6 + $0xa0] sm:$0xff]   ;;  %vm2366_vm3 = vmand %vm77_vm1, %vm78_vm0  ;;  %vm166_vm11 = vsmask.f32 3328  ;;  %vm167_vm12 = vsmask.f32 7440 }
  0x4f   :  { %1757 = vmatprep.subr.bf16.mxu1 %v2048_v5  ;;  %v2054_v11 = vld [vmem:[#allocation6 + $0x98] sm:$0xff]   ;;  %v2056_v15 = vld [vmem:[#allocation6 + $0x20] sm:$0xff]   ;;  %v2058_v16 = vld [vmem:[#allocation6 + $0x68] sm:$0xff]   ;;  %vm2258_vm15 = vmmov 0  }
  0x50   :  { %1614 = vmatpush3.bf16.msra.mxu0 %v2047_v4  ;;  %vm2371_vm4 = vmand %vm77_vm1, %vm86_vm2  ;;  %v2060_v18 = vld [vmem:[#allocation6 + $0xa8] sm:$0xff]   ;;  %v2061_v20 = vld [vmem:[#allocation6 + $0x70] sm:$0xff]  }
  0x51   :  { %1615 = vmatprep.subr.bf16.mxu0 %v2049_v6  ;;  %v2059_v19 = vld [vmem:[#allocation6 + $0x28] sm:$0xff]   ;;  %v2062_v21 = vld [vmem:[#allocation6 + $0x30] sm:$0xff]   ;;  %v2064_v23 = vld [vmem:[#allocation6 + $0x78] sm:$0xff]  }
  0x52   :  { %1758 = vmatpush3.bf16.msra.mxu1 %v2048_v5  ;;  %v2063_v22 = vld [vmem:[#allocation6 + $0xb0] sm:$0xff]   ;;  %v2066_v24 = vld [vmem:[#allocation6 + $0xb8] sm:$0xff]   ;;  %v88_v26 = vld [vmem:[#allocation2 + $0x8] sm:$0x1] }
  0x53   :  { %1759 = vmatprep.subr.bf16.mxu1 %v2051_v8  ;;  %v80_v25 = vld [vmem:[#allocation2] sm:$0x1]  ;;  %v94_v27 = vld [vmem:[#allocation3] sm:$0xf]  ;;  %v89_v29 = vsel %vm2371_vm4, 0, %v88_v26  ;;  %vm2385_vm7 = vmor %vm78_vm0, %vm98_vm5 }
  0x54   :  { %1616 = vmatpush3.bf16.msra.mxu0 %v2050_v7  ;;  %v81_v28 = vsel %vm2366_vm3, 0, %v80_v25  ;;  %v95_v30 = vld [vmem:[#allocation3 + $0x4] sm:$0xf]  ;;  %v101_v31 = vshrl.u32 %v94_v27, 16  ;;  %v104_v32 = vshll.u32 %v94_v27, 16  ;;  %v2065_v37 = vld [vmem:[#allocation6 + $0x38] sm:$0xff]   ;;  %vm2391_vm8 = vmand %vm140_vm6, %vm86_vm2 }
  0x55   :  { %1617 = vmatprep.subr.bf16.mxu0 %v2052_v9  ;;  %82 = vst [vmem:[#allocation2] sm:$0x1] %v81_v28  ;;  %90 = vst [vmem:[#allocation2 + $0x8] sm:$0x1] %v89_v29  ;;  %v109_v33 = vshrl.u32 %v95_v30, 16  ;;  %v112_v34 = vshll.u32 %v95_v30, 16 }
  0x56   :  { %1760 = vmatpush3.bf16.msra.mxu1 %v2051_v8  ;;  %v83_v35 = vld [vmem:[#allocation2 + $0xc] sm:$0x1]  ;;  %v91_v36 = vld [vmem:[#allocation2 + $0x14] sm:$0x1]  ;;  %v103_v38 = vrot.slane %v101_v31, 7  ;;  %vm2415_vm13 = vmor %vm225_vm9, %vm226_vm10 }
  0x57   :  { %1761 = vmatprep.subr.bf16.mxu1 %v2054_v11  ;;  %v84_v39 = vsel %vm2366_vm3, 0, %v83_v35  ;;  %v92_v40 = vsel %vm2371_vm4, 0, %v91_v36  ;;  %v96_v41 = vld [vmem:[#allocation3 + $0x8] sm:$0xf]  ;;  %v111_v42 = vrot.slane %v109_v33, 7  ;;  %vm2422_vm14 = vmor %vm166_vm11, %vm167_vm12 }
  0x58   :  { %1618 = vmatpush3.bf16.msra.mxu0 %v2053_v10  ;;  %85 = vst [vmem:[#allocation2 + $0xc] sm:$0x1] %v84_v39  ;;  %93 = vst [vmem:[#allocation2 + $0x14] sm:$0x1] %v92_v40  ;;  %v97_v43 = vld [vmem:[#allocation3 + $0xc] sm:$0xf]  ;;  %v106_v50 = vor.u32 %v104_v32, %v103_v38 }
  0x59   :  { %1619 = vmatprep.subr.bf16.mxu0 %v2055_v12  ;;  %v118_v44 = vshrl.u32 %v96_v41, 16  ;;  %v121_v45 = vshll.u32 %v96_v41, 16  ;;  %v107_v47 = vrot.slane %v103_v38, 4  ;;  %v126_v48 = vshrl.u32 %v97_v43, 16  ;;  %v567_v41 = vld [vmem:[#allocation9] sm:$0xff] }
  0x5a   :  { %1762 = vmatpush3.bf16.msra.mxu1 %v2054_v11  ;;  %v129_v49 = vshll.u32 %v97_v43, 16  ;;  %v114_v51 = vor.u32 %v112_v34, %v111_v42  ;;  %v116_v52 = vrot.slane %v111_v42, 4 }
  0x5b   :  { %1763 = vmatprep.subr.bf16.mxu1 %v2057_v13  ;;  %v120_v53 = vrot.slane %v118_v44, 7  ;;  %v128_v55 = vrot.slane %v126_v48, 7 }
  0x5c   :  { %1620 = vmatpush3.bf16.msra.mxu0 %v2056_v15  ;;  %v115_v56 = vsel %vm2385_vm7, %v107_v47, %v114_v51  ;;  %v142_v60 = vld [vmem:[#allocation2] sm:$0xf]  ;;  %v146_v61 = vld [vmem:[#allocation2 + $0x8] sm:$0x1]  ;;  %v568_v51 = vld [vmem:[#allocation9 + $0x8] sm:$0xff] }
  0x5d   :  { %1621 = vmatprep.subr.bf16.mxu0 %v2058_v16  ;;  %v123_v57 = vor.u32 %v121_v45, %v120_v53  ;;  %v124_v58 = vrot.slane %v120_v53, 4  ;;  %145 = vst [vmem:[#allocation2 + $0x4] sm:$0xf] %v115_v56  ;;  %v131_v62 = vor.u32 %v129_v49, %v128_v55  ;;  %v133_v63 = vrot.slane %v128_v55, 4 }
  0x5e   :  { %1764 = vmatpush3.bf16.msra.mxu1 %v2057_v13  ;;  %v143_v0 = vsel %vm2391_vm8, %v106_v50, %v142_v60  ;;  %v147_v1 = vsel %vm2366_vm3, %v116_v52, %v146_v61 }
  0x5f   :  { %1765 = vmatprep.subr.bf16.mxu1 %v2060_v18  ;;  %144 = vst [vmem:[#allocation2] sm:$0xf] %v143_v0  ;;  %148 = vst [vmem:[#allocation2 + $0x8] sm:$0x1] %v147_v1  ;;  %v132_v2 = vsel %vm2385_vm7, %v124_v58, %v131_v62  ;;  %v149_v3 = vld [vmem:[#allocation2 + $0xc] sm:$0xf]  ;;  %v2438_v1 = vpack.c.bf16 %v568_v51, %v567_v41 }
  0x60   :  { %1622 = vmatpush3.bf16.msra.mxu0 %v2059_v19  ;;  %v153_v4 = vld [vmem:[#allocation2 + $0x14] sm:$0x1]  ;;  %v150_v5 = vsel %vm2391_vm8, %v123_v57, %v149_v3  ;;  %152 = vst [vmem:[#allocation2 + $0x10] sm:$0xf] %v132_v2 }
  0x61   :  { %1623 = vmatprep.subr.bf16.mxu0 %v2061_v20  ;;  %v154_v6 = vsel %vm2366_vm3, %v133_v63, %v153_v4  ;;  %151 = vst [vmem:[#allocation2 + $0xc] sm:$0xf] %v150_v5 }
  0x62   :  { %1766 = vmatpush3.bf16.msra.mxu1 %v2060_v18  ;;  %155 = vst [vmem:[#allocation2 + $0x14] sm:$0x1] %v154_v6 }
  0x63   :  { %1767 = vmatprep.subr.bf16.mxu1 %v2063_v22 }
  0x64   :  { %1624 = vmatpush3.bf16.msra.mxu0 %v2062_v21  ;;  %v161_v7 = vld [vmem:[#allocation2 + $0x4] sm:$0xf] }
  0x65   :  { %1625 = vmatprep.subr.bf16.mxu0 %v2064_v23  ;;  %v179_v8 = vshll.u32 %v161_v7, 16  ;;  %v183_v9 = vshrl.u32 %v161_v7, 16  ;;  %v230_v10 = vrot.slane %v161_v7, 5 }
  0x66   :  { %1768 = vmatpush3.bf16.msra.mxu1 %v2063_v22  ;;  %v2409_v11 = vld [vmem:[#allocation2] sm:$0xf]  ;;  %v164_v12 = vld [vmem:[#allocation2 + $0x8] sm:$0x1] }
  0x67   :  { %1769 = vmatprep.subr.bf16.mxu1 %v2066_v24  ;;  %v217_v13 = vld [vmem:[#allocation2] sm:$0xe]  ;;  %v170_v15 = vshrl.u32 %v2409_v11, 16  ;;  %v173_v16 = vshll.u32 %v2409_v11, 16  ;;  %v181_v17 = vrot.slane %v179_v8, 5  ;;  %v185_v18 = vrot.slane %v183_v9, 4 }
  0x68   :  { %1626 = vmatpush3.bf16.msra.mxu0 %v2065_v37  ;;  %v163_v20 = vld [vmem:[#allocation2 + $0x10] sm:$0xf]  ;;  %v189_v21 = vshll.u32 %v164_v12, 16  ;;  %v1522_v22 = vcombine.low %v2409_v11, %v161_v7  ;;  %v1520_v23 = vrot.slane %v217_v13, 9  ;;  %v233_v29 = vrot.slane %v164_v12, 5  ;;  %v570_v12 = vld [vmem:[#allocation9 + $0x18] sm:$0xff] }
  0x69   :  { %1935 = vmatprep.subr.bf16.mxu0 %v2257_v59  ;;  %v165_v25 = vld [vmem:[#allocation2 + $0x14] sm:$0x1]  ;;  %v172_v26 = vrot.slane %v170_v15, 4  ;;  %v175_v27 = vrot.slane %v173_v16, 5  ;;  %v186_v28 = vor.u32 %v185_v18, %v181_v17  ;;  %v218_v30 = vld [vmem:[#allocation2 + $0xc] sm:$0xe] }
  0x6a   :  { %1770 = vmatpush3.bf16.msra.mxu1 %v2066_v24  ;;  %v232_v24 = vrot.slane %v230_v10, 4  ;;  %v191_v32 = vrot.slane %v189_v21, 5  ;;  %v231_v33 = vsel %vm2415_vm13, %v1520_v23, %v230_v10  ;;  %v1521_v34 = vrot.slane %v218_v30, 9  ;;  %v162_v36 = vld [vmem:[#allocation2 + $0xc] sm:$0xf]  ;;  %v569_v10 = vld [vmem:[#allocation9 + $0x10] sm:$0xff] }
  0x6b   :  { %1959 = vmatprep.subr.bf16.mxu1 %v2257_v59  ;;  %v237_v35 = vrot.slane %v163_v20, 5  ;;  %v176_v37 = vor.u32 %v175_v27, %v172_v26  ;;  %v187_v38 = vrot.slane %v186_v28, 4  ;;  %v240_v40 = vrot.slane %v165_v25, 5  ;;  %v571_v15 = vld [vmem:[#allocation9 + $0x20] sm:$0xff]  ;;  %v572_v16 = vld [vmem:[#allocation9 + $0x28] sm:$0xff]  ;;  %v573_v18 = vld [vmem:[#allocation9 + $0x30] sm:$0xff] }
  0x6c   :  { %v234_v39 = vsel %vm2415_vm13, %v232_v24, %v233_v29  ;;  %v194_v45 = vshrl.u32 %v162_v36, 16  ;;  %v197_v49 = vshll.u32 %v162_v36, 16  ;;  %v203_v50 = vshll.u32 %v163_v20, 16  ;;  %v576_v23 = vld [vmem:[#allocation9 + $0x48] sm:$0xff]  ;;  %v578_v26 = vld [vmem:[#allocation9 + $0x58] sm:$0xff]  ;;  %v579_v28 = vld [vmem:[#allocation9 + $0x60] sm:$0xff] }
  0x6d   :  { %v1526_v42 = vcombine.low %v231_v33, %v234_v39  ;;  %v238_v43 = vsel %vm2415_vm13, %v1521_v34, %v237_v35  ;;  %v239_v44 = vrot.slane %v237_v35, 4  ;;  %v177_v47 = vrot.slane %v176_v37, 4  ;;  %v580_v29 = vld [vmem:[#allocation9 + $0x68] sm:$0xff]  ;;  %v582_v33 = vld [vmem:[#allocation9 + $0x78] sm:$0xff] }
  0x6e   :  { %v192_v48 = vsel %vm2422_vm14, %v187_v38, %v191_v32  ;;  %v196_v53 = vrot.slane %v194_v45, 4  ;;  %v207_v55 = vshrl.u32 %v163_v20, 16  ;;  %v213_v56 = vshll.u32 %v165_v25, 16  ;;  %v577_v25 = vld [vmem:[#allocation9 + $0x50] sm:$0xff] }
  0x6f   :  { %1771 = vmatprep.mubr.bf16.mxu1 %v1526_v42  ;;  %v241_v52 = vsel %vm2415_vm13, %v239_v44, %v240_v40  ;;  %v182_v57 = vsel %vm2422_vm14, %v177_v47, %v181_v17  ;;  %v199_v60 = vrot.slane %v197_v49, 5  ;;  %v205_v61 = vrot.slane %v203_v50, 5  ;;  %v581_v32 = vld [vmem:[#allocation9 + $0x70] sm:$0xff] }
  0x70   :  { %v1527_v58 = vcombine.low %v238_v43, %v241_v52  ;;  %v1524_v62 = vcombine.low %v182_v57, %v192_v48  ;;  %v209_v63 = vrot.slane %v207_v55, 4  ;;  %v215_v0 = vrot.slane %v213_v56, 5 }
  0x71   :  { %v200_v2 = vor.u32 %v199_v60, %v196_v53  ;;  %v1523_v9 = vcombine.low %v162_v36, %v163_v20  ;;  %v2448_v13 = vpack.c.bf16 %v570_v12, %v569_v10  ;;  %v2454_v17 = vpack.c.bf16 %v572_v16, %v571_v15  ;;  %v574_v20 = vld [vmem:[#allocation9 + $0x38] sm:$0xff] }
  0x72   :  { %1772 = vmatmul.mubr.bf16.vlgmr.msra.gmra.mrb[0].mxu1 %v1527_v58  ;;  %492 = vmatprep.mubr.bf16.mxu0 %v1524_v62  ;;  %v210_v3 = vor.u32 %v209_v63, %v205_v61  ;;  %v2460_v21 = vpack.c.bf16 %v574_v20, %v573_v18  ;;  %v2472_v27 = vpack.c.bf16 %v578_v26, %v577_v25  ;;  %v2259_v35 = vmov 0.0  }
  0x73   :  { %1961 = vmatpush3.bf16.msra.mxu1 %v2438_v1  ;;  %493 = vmatmul.mubr.bf16.vlgmr.msra.gmra.mrb[0].mxu0 %v1522_v22  ;;  %v201_v4 = vrot.slane %v200_v2, 4  ;;  %v575_v22 = vld [vmem:[#allocation9 + $0x40] sm:$0xff]  ;;  %v2478_v30 = vpack.c.bf16 %v580_v29, %v579_v28  ;;  %v2484_v34 = vpack.c.bf16 %v582_v33, %v581_v32 }
  0x74   :  { %1962 = vmatprep.subr.bf16.mxu1 %v2257_v59  ;;  %v211_v5 = vrot.slane %v210_v3, 4  ;;  %1937 = vmatpush3.bf16.msra.mxu0 %v2438_v1  ;;  %v2466_v24 = vpack.c.bf16 %v576_v23, %v575_v22 }
  0x75   :  { %v206_v6 = vsel %vm2422_vm14, %v201_v4, %v205_v61  ;;  %1938 = vmatprep.subr.bf16.mxu0 %v2257_v59  ;;  %1842 = vmatprep.mubr.msk.f32.mxu1 %vm2258_vm15, %v2259_v35 }
  0x76   :  { %v216_v7 = vsel %vm2422_vm14, %v211_v5, %v215_v0  ;;  %v654_v5 = vlaneseq }
  0x77   :  { %v1525_v8 = vcombine.low %v206_v6, %v216_v7  ;;  %1964 = vmatpush3.bf16.msra.mxu1 %v2448_v13 }
  0x78   :  { %1940 = vmatpush3.bf16.msra.mxu0 %v2448_v13  ;;  %1965 = vmatprep.subr.bf16.mxu1 %v2257_v59  ;;  %v655_v6 = vshrl.u32 %v654_v5, 7 }
  0x79   :  { %500 = vmatprep.mubr.bf16.mxu0 %v1525_v8  ;;  %1941 = vmatprep.subr.bf16.mxu0 %v2257_v59 }
  0x7a   :  { %v2492_v7 = vsub.s32 0, %v655_v6 }
  0x7b   :  { %501 = vmatmul.mubr.bf16.gmra.mrb[4].mxu0 %v1523_v9  ;;  %1967 = vmatpush3.bf16.msra.mxu1 %v2454_v17 }
  0x7c   :  { %1943 = vmatpush3.bf16.msra.mxu0 %v2454_v17  ;;  %1968 = vmatprep.subr.bf16.mxu1 %v2257_v59 }
  0x7d   :  { %1944 = vmatprep.subr.bf16.mxu0 %v2257_v59  ;;  %1807 = vmatprep.mubr.msk.f32.mxu0 %vm2258_vm15, %v2259_v35 }
  0x7f   :  { %1970 = vmatpush3.bf16.msra.mxu1 %v2460_v21 }
  0x80   :  { %1946 = vmatpush3.bf16.msra.mxu0 %v2460_v21  ;;  %1971 = vmatprep.subr.bf16.mxu1 %v2257_v59 }
  0x81   :  { %1947 = vmatprep.subr.bf16.mxu0 %v2257_v59 }
  0x83   :  { %1973 = vmatpush3.bf16.msra.mxu1 %v2466_v24 }
  0x84   :  { %1949 = vmatpush3.bf16.msra.mxu0 %v2466_v24  ;;  %1974 = vmatprep.subr.bf16.mxu1 %v2257_v59 }
  0x85   :  { %1950 = vmatprep.subr.bf16.mxu0 %v2257_v59 }
  0x87   :  { %1976 = vmatpush3.bf16.msra.mxu1 %v2472_v27 }
  0x88   :  { %1952 = vmatpush3.bf16.msra.mxu0 %v2472_v27  ;;  %1977 = vmatprep.subr.bf16.mxu1 %v2257_v59 }
  0x89   :  { %1953 = vmatprep.subr.bf16.mxu0 %v2257_v59 }
  0x8b   :  { %1979 = vmatpush3.bf16.msra.mxu1 %v2478_v30 }
  0x8c   :  { %1955 = vmatpush3.bf16.msra.mxu0 %v2478_v30  ;;  %1980 = vmatprep.subr.bf16.mxu1 %v2257_v59 }
  0x8d   :  { %1956 = vmatprep.subr.bf16.mxu0 %v2257_v59 }
  0x8f   :  { %1982 = vmatpush3.bf16.msra.mxu1 %v2484_v34 }
  0x90   :  { %1958 = vmatpush3.bf16.msra.mxu0 %v2484_v34 }
 0x145   :  { %v1773_v36 = vpop.f32.mrb[0].mxu1 }
 0x146   :  { %v543_v37 = vpop.f32.mrb[1].mxu1  ;;  %v1627_v38 = vpop.f32.mrb[0].mxu0 }
 0x147   :  { %v1774_v39 = vpop.f32.mrb[2].mxu1  ;;  %v1628_v40 = vpop.f32.mrb[1].mxu0 }
 0x148   :  { %v546_v41 = vpop.f32.mrb[3].mxu1  ;;  %v1629_v42 = vadd.f32 %v1628_v40, %v1627_v38  ;;  %v1630_v43 = vpop.f32.mrb[2].mxu0 }
 0x149   :  { %v1631_v44 = vpop.f32.mrb[3].mxu0 }
 0x14a   :  { %v1632_v45 = vadd.f32 %v1631_v44, %v1630_v43  ;;  %v544_v47 = vadd.f32 %v1629_v42, %v543_v37  ;;  %v2070_v42 = vld [vmem:[#allocation8 + $0x40] sm:$0xff]   ;;  %v2071_v43 = vld [vmem:[#allocation8 + $0x88] sm:$0xff]  }
 0x14b   :  { %v2072_v44 = vld [vmem:[#allocation8] sm:$0xff]   ;;  %1683 = vmatprep.subr.bf16.mxu0 %v2070_v42 }
 0x14c   :  { %v547_v48 = vadd.f32 %v1632_v45, %v546_v41  ;;  %v2069_v41 = vld [vmem:[#allocation8 + $0x80] sm:$0xff]   ;;  %v2073_v45 = vld [vmem:[#allocation8 + $0x48] sm:$0xff]  }
 0x14d   :  { %1845 = vmatprep.subr.bf16.mxu1 %v2069_v41 }
 0x14e   :  { %v1633_v49 = vpop.f32.mrb[4].mxu0  ;;  %v558_v55 = vadd.f32 %v547_v48, %v544_v47 }
 0x14f   :  { %v1634_v50 = vpop.f32.mrb[5].mxu0 }
 0x150   :  { %v1635_v51 = vadd.f32 %v1634_v50, %v1633_v49  ;;  %v1636_v52 = vpop.f32.mrb[6].mxu0  ;;  %v2076_v49 = vld [vmem:[#allocation8 + $0x50] sm:$0xff]   ;;  %v2077_v50 = vld [vmem:[#allocation8 + $0x98] sm:$0xff]  }
 0x151   :  { %v1637_v53 = vpop.f32.mrb[7].mxu0 }
 0x152   :  { %v552_v56 = vadd.f32 %v1773_v36, %v1635_v51  ;;  %v1638_v57 = vadd.f32 %v1637_v53, %v1636_v52  ;;  %v2078_v51 = vld [vmem:[#allocation8 + $0x10] sm:$0xff]   ;;  %v2079_v52 = vld [vmem:[#allocation8 + $0x58] sm:$0xff]   ;;  %v2080_v53 = vld [vmem:[#allocation8 + $0xa0] sm:$0xff]  }
 0x154   :  { %v559_v58 = vadd.f32 %v558_v55, %v552_v56  ;;  %v555_v60 = vadd.f32 %v1774_v39, %v1638_v57  ;;  %v2081_v55 = vld [vmem:[#allocation8 + $0x18] sm:$0xff]   ;;  %v2083_v57 = vld [vmem:[#allocation8 + $0xa8] sm:$0xff]  }
 0x156   :  { %v560_v61 = vadd.f32 %v559_v58, %v555_v60  ;;  %v2084_v58 = vld [vmem:[#allocation8 + $0x20] sm:$0xff]  }
 0x158   :  { %v561_v62 = vrot.slane %v560_v61, 4 }
 0x15a   :  { %v562_v63 = vadd.f32 %v561_v62, %v560_v61  ;;  %v2086_v61 = vld [vmem:[#allocation8 + $0xb0] sm:$0xff]   ;;  %v2087_v62 = vld [vmem:[#allocation8 + $0x28] sm:$0xff]  }
 0x15c   :  { %v563_v0 = vrot.slane %v562_v63, 2 }
 0x15e   :  { %v564_v2 = vadd.f32 %v563_v0, %v562_v63  ;;  %v2088_v63 = vld [vmem:[#allocation8 + $0x70] sm:$0xff]   ;;  %v2089_v0 = vld [vmem:[#allocation8 + $0xb8] sm:$0xff]  }
 0x160   :  { %v565_v3 = vrot.slane %v564_v2, 1 }
 0x162   :  { %v566_v4 = vadd.f32 %v565_v3, %v564_v2  ;;  %v2090_v2 = vld [vmem:[#allocation8 + $0x30] sm:$0xff]   ;;  %v2091_v3 = vld [vmem:[#allocation8 + $0x78] sm:$0xff]  }
 0x164   :  { %1808 = vmatmul.mubr.f32.vlgmr.msra.gmra.mrb[8].mxu0 %v566_v4  ;;  %v2092_v4 = vld [vmem:[#allocation8 + $0x38] sm:$0xff]  }
 0x165   :  { %1684 = vmatpush3.bf16.msra.mxu0 %v2072_v44 }
 0x166   :  { %1685 = vmatprep.subr.bf16.mxu0 %v2073_v45 }
 0x237   :  { %v649_v8 = vpop.f32.mrb[8].mxu0 }
 0x238   :  { %v653_v9 = vmul.f32 0.001953125, %v649_v8  ;;  %v1809_v10 = vpop.f32.mrb[9].mxu0 }
 0x239   :  { %v156_v10 = vld [vmem:[%s2619_s3] sm:$0x1] }
 0x23a   :  { %v657_v12 = vrot.slane %v653_v9, %v2492_v7 }
 0x23c   :  { %v2495_v15 = vsub.f32 %v544_v47, %v657_v12  ;;  %v2497_v16 = vsub.f32 %v547_v48, %v657_v12  ;;  %v2499_v18 = vsub.f32 %v552_v56, %v657_v12  ;;  %v2501_v20 = vsub.f32 %v555_v60, %v657_v12  ;;  %v2074_v47 = vld [vmem:[#allocation8 + $0x90] sm:$0xff]   ;;  %v2075_v48 = vld [vmem:[#allocation8 + $0x8] sm:$0xff]   ;;  %v2082_v56 = vld [vmem:[#allocation8 + $0x60] sm:$0xff]  }
 0x23d   :  { %1686 = vmatpush3.bf16.msra.mxu0 %v2075_v48  ;;  %v2085_v60 = vld [vmem:[#allocation8 + $0x68] sm:$0xff]  }
 0x23e   :  { %v662_v22 = vmul.f32 %v2495_v15, %v2495_v15  ;;  %v663_v23 = vmul.f32 %v2497_v16, %v2497_v16  ;;  %v664_v25 = vmul.f32 %v2499_v18, %v2499_v18  ;;  %v665_v28 = vmul.f32 %v2501_v20, %v2501_v20  ;;  %1687 = vmatprep.subr.bf16.mxu0 %v2076_v49 }
 0x240   :  { %v666_v26 = vadd.f32 %v663_v23, %v662_v22 }
 0x241   :  { %1688 = vmatpush3.bf16.msra.mxu0 %v2078_v51 }
 0x242   :  { %v667_v29 = vadd.f32 %v666_v26, %v664_v25  ;;  %1689 = vmatprep.subr.bf16.mxu0 %v2079_v52  ;;  %v1552_v25 = vld [vmem:[%s2619_s3 + $0x1] ss:$0 sm:$0xff] }
 0x244   :  { %v668_v32 = vadd.f32 %v667_v29, %v665_v28 }
 0x245   :  { %1690 = vmatpush3.bf16.msra.mxu0 %v2081_v55 }
 0x246   :  { %v669_v33 = vrot.slane %v668_v32, 4  ;;  %1691 = vmatprep.subr.bf16.mxu0 %v2082_v56 }
 0x248   :  { %v670_v36 = vadd.f32 %v669_v33, %v668_v32 }
 0x249   :  { %1692 = vmatpush3.bf16.msra.mxu0 %v2084_v58 }
 0x24a   :  { %v671_v37 = vrot.slane %v670_v36, 2  ;;  %1693 = vmatprep.subr.bf16.mxu0 %v2085_v60 }
 0x24c   :  { %v672_v38 = vadd.f32 %v671_v37, %v670_v36 }
 0x24d   :  { %1694 = vmatpush3.bf16.msra.mxu0 %v2087_v62 }
 0x24e   :  { %v673_v39 = vrot.slane %v672_v38, 1  ;;  %1695 = vmatprep.subr.bf16.mxu0 %v2088_v63 }
 0x250   :  { %v674_v40 = vadd.f32 %v673_v39, %v672_v38 }
 0x251   :  { %1696 = vmatpush3.bf16.msra.mxu0 %v2090_v2 }
 0x252   :  { %1843 = vmatmul.mubr.f32.vlgmr.msra.gmra.mrb[4].mxu1 %v674_v40  ;;  %1697 = vmatprep.subr.bf16.mxu0 %v2091_v3 }
 0x253   :  { %1846 = vmatpush3.bf16.msra.mxu1 %v2069_v41 }
 0x254   :  { %1847 = vmatprep.subr.bf16.mxu1 %v2071_v43 }
 0x255   :  { %1698 = vmatpush3.bf16.msra.mxu0 %v2092_v4 }
 0x256   :  { %1983 = vmatprep.subr.bf16.mxu0 %v2257_v59 }
 0x257   :  { %1848 = vmatpush3.bf16.msra.mxu1 %v2071_v43 }
 0x258   :  { %1849 = vmatprep.subr.bf16.mxu1 %v2074_v47 }
 0x25b   :  { %1850 = vmatpush3.bf16.msra.mxu1 %v2074_v47 }
 0x25c   :  { %1851 = vmatprep.subr.bf16.mxu1 %v2077_v50 }
 0x25f   :  { %1852 = vmatpush3.bf16.msra.mxu1 %v2077_v50 }
 0x260   :  { %1853 = vmatprep.subr.bf16.mxu1 %v2080_v53 }
 0x263   :  { %1854 = vmatpush3.bf16.msra.mxu1 %v2080_v53 }
 0x264   :  { %1855 = vmatprep.subr.bf16.mxu1 %v2083_v57 }
 0x267   :  { %1856 = vmatpush3.bf16.msra.mxu1 %v2083_v57 }
 0x268   :  { %1857 = vmatprep.subr.bf16.mxu1 %v2086_v61 }
 0x26b   :  { %1858 = vmatpush3.bf16.msra.mxu1 %v2086_v61 }
 0x26c   :  { %1859 = vmatprep.subr.bf16.mxu1 %v2089_v0 }
 0x26f   :  { %1860 = vmatpush3.bf16.msra.mxu1 %v2089_v0 }
 0x270   :  { %2007 = vmatprep.subr.bf16.mxu1 %v2257_v59 }
 0x325   :  { %v741_v5 = vpop.f32.mrb[4].mxu1 }
 0x326   :  { %v745_v6 = vmul.f32 0.001953125, %v741_v5  ;;  %v1844_v8 = vpop.f32.mrb[5].mxu1 }
 0x328   :  { %v746_v9 = vadd.f32 1e-05, %v745_v6 }
 0x32a   :  { %2095 = vrsqrt.f32 %v746_v9 }
 0x334   :  { %v2096_v12 = vpop.eup %2095 }
 0x335   :  { %v748_v22 = vmul.f32 %v2096_v12, %v156_v10 }
 0x337   :  { %v752_v23 = vrot.slane %v748_v22, %v2492_v7  ;;  %v848_v22 = vld [vmem:[#allocation2 + $0x8] sm:$0x1] }
 0x339   :  { %v753_v26 = vmul.f32 %v752_v23, %v2495_v15  ;;  %v754_v28 = vmul.f32 %v752_v23, %v2497_v16  ;;  %v755_v29 = vmul.f32 %v752_v23, %v2499_v18  ;;  %v756_v32 = vmul.f32 %v752_v23, %v2501_v20 }
 0x33b   :  { %v761_v33 = vadd.f32 %v1552_v25, %v753_v26  ;;  %v762_v36 = vadd.f32 %v1552_v25, %v754_v28  ;;  %v763_v37 = vadd.f32 %v1552_v25, %v755_v29  ;;  %v764_v38 = vadd.f32 %v1552_v25, %v756_v32  ;;  %v851_v29 = vld [vmem:[#allocation2 + $0xc] sm:$0xf] }
 0x33d   :  { %v1553_v39 = vmul.f32 -1.442695, %v761_v33  ;;  %v1554_v40 = vmul.f32 -1.442695, %v762_v36  ;;  %v1555_v41 = vmul.f32 -1.442695, %v763_v37 }
 0x33e   :  { %v1556_v42 = vmul.f32 -1.442695, %v764_v38 }
 0x33f   :  { %2097 = vpow2.f32 %v1553_v39 }
 0x340   :  { %2099 = vpow2.f32 %v1554_v40 }
 0x341   :  { %2101 = vpow2.f32 %v1555_v41 }
 0x342   :  { %2103 = vpow2.f32 %v1556_v42 }
 0x349   :  { %v2098_v43 = vpop.eup %2097 }
 0x34a   :  { %v2100_v15 = vpop.eup %2099  ;;  %v777_v44 = vadd.f32 1.0, %v2098_v43 }
 0x34b   :  { %v2102_v16 = vpop.eup %2101  ;;  %v778_v45 = vadd.f32 1.0, %v2100_v15 }
 0x34c   :  { %v2104_v18 = vpop.eup %2103  ;;  %v779_v47 = vadd.f32 1.0, %v2102_v16  ;;  %2105 = vrcp.f32 %v777_v44 }
 0x34d   :  { %v780_v20 = vadd.f32 1.0, %v2104_v18  ;;  %2107 = vrcp.f32 %v778_v45 }
 0x34e   :  { %2109 = vrcp.f32 %v779_v47 }
 0x34f   :  { %2111 = vrcp.f32 %v780_v20 }
 0x356   :  { %v2106_v48 = vpop.eup %2105 }
 0x357   :  { %v2108_v49 = vpop.eup %2107  ;;  %v789_v50 = vmul.f32 %v2106_v48, %v761_v33 }
 0x358   :  { %v2110_v51 = vpop.eup %2109  ;;  %v790_v52 = vmul.f32 %v2108_v49, %v762_v36 }
 0x359   :  { %v2112_v53 = vpop.eup %2111  ;;  %v791_v55 = vmul.f32 %v2110_v51, %v763_v37  ;;  %v1598_v56 = vpack.c.bf16 %v789_v50, %v789_v50  ;;  %v855_v37 = vld [vmem:[#allocation2 + $0x14] sm:$0x1] }
 0x35a   :  { %v792_v57 = vmul.f32 %v2112_v53, %v764_v38  ;;  %v1599_v58 = vpack.c.bf16 %v790_v52, %v790_v52 }
 0x35b   :  { %v1600_v60 = vpack.c.bf16 %v791_v55, %v791_v55  ;;  %v806_v61 = vshrl.u32 %v1598_v56, 16  ;;  %v809_v2 = vshll.u32 %v1598_v56, 16 }
 0x35c   :  { %v1601_v62 = vpack.c.bf16 %v792_v57, %v792_v57  ;;  %v814_v63 = vshrl.u32 %v1599_v58, 16  ;;  %v817_v5 = vshll.u32 %v1599_v58, 16 }
 0x35d   :  { %v808_v0 = vrot.slane %v806_v61, 7  ;;  %v823_v3 = vshrl.u32 %v1600_v60, 16  ;;  %v826_v12 = vshll.u32 %v1600_v60, 16 }
 0x35e   :  { %v816_v4 = vrot.slane %v814_v63, 7  ;;  %v831_v6 = vshrl.u32 %v1601_v62, 16  ;;  %v834_v28 = vshll.u32 %v1601_v62, 16 }
 0x35f   :  { %v811_v8 = vor.u32 %v809_v2, %v808_v0  ;;  %v812_v9 = vrot.slane %v808_v0, 4  ;;  %v825_v10 = vrot.slane %v823_v3, 7 }
 0x360   :  { %v819_v23 = vor.u32 %v817_v5, %v816_v4  ;;  %v821_v25 = vrot.slane %v816_v4, 4  ;;  %v833_v26 = vrot.slane %v831_v6, 7 }
 0x361   :  { %v828_v32 = vor.u32 %v826_v12, %v825_v10  ;;  %v829_v33 = vrot.slane %v825_v10, 4  ;;  %v845_v36 = vsel %vm2391_vm8, %v811_v8, %v2409_v11 }
 0x362   :  { %v820_v38 = vsel %vm2385_vm7, %v812_v9, %v819_v23  ;;  %v836_v39 = vor.u32 %v834_v28, %v833_v26  ;;  %v838_v40 = vrot.slane %v833_v26, 4  ;;  %v849_v41 = vsel %vm2366_vm3, %v821_v25, %v848_v22  ;;  %846 = vst [vmem:[#allocation2] sm:$0xf] %v845_v36 }
 0x363   :  { %847 = vst [vmem:[#allocation2 + $0x4] sm:$0xf] %v820_v38  ;;  %v852_v42 = vsel %vm2391_vm8, %v828_v32, %v851_v29  ;;  %850 = vst [vmem:[#allocation2 + $0x8] sm:$0x1] %v849_v41 }
 0x364   :  { %v837_v43 = vsel %vm2385_vm7, %v829_v33, %v836_v39  ;;  %v856_v11 = vsel %vm2366_vm3, %v838_v40, %v855_v37  ;;  %853 = vst [vmem:[#allocation2 + $0xc] sm:$0xf] %v852_v42 }
 0x365   :  { %854 = vst [vmem:[#allocation2 + $0x10] sm:$0xf] %v837_v43  ;;  %857 = vst [vmem:[#allocation2 + $0x14] sm:$0x1] %v856_v11 }
 0x369   :  { %v912_v15 = vld [vmem:[#allocation2] sm:$0xe] }
 0x36a   :  { %v858_v44 = vld [vmem:[#allocation2] sm:$0xf]  ;;  %v859_v16 = vld [vmem:[#allocation2 + $0x4] sm:$0xf]  ;;  %v862_v45 = vld [vmem:[#allocation2 + $0x8] sm:$0x1] }
 0x36b   :  { %v1561_v18 = vrot.slane %v912_v15, 9  ;;  %v865_v47 = vshrl.u32 %v858_v44, 16  ;;  %v922_v20 = vrot.slane %v859_v16, 5  ;;  %v913_v48 = vld [vmem:[#allocation2 + $0xc] sm:$0xe]  ;;  %v868_v54 = vshll.u32 %v858_v44, 16 }
 0x36c   :  { %v874_v49 = vshll.u32 %v859_v16, 16  ;;  %v2537_v50 = vld [vmem:[#allocation2 + $0x10] sm:$0xf]  ;;  %v863_v46 = vld [vmem:[#allocation2 + $0x14] sm:$0x1]  ;;  %v1562_v51 = vrot.slane %v913_v48, 9  ;;  %v1563_v11 = vcombine.low %v858_v44, %v859_v16 }
 0x36d   :  { %v867_v52 = vrot.slane %v865_v47, 4  ;;  %v923_v14 = vsel %vm2415_vm13, %v1561_v18, %v922_v20  ;;  %v924_v53 = vrot.slane %v922_v20, 4  ;;  %v925_v55 = vrot.slane %v862_v45, 5  ;;  %v860_v57 = vld [vmem:[#allocation2 + $0xc] sm:$0xf] }
 0x36e   :  { %v929_v56 = vrot.slane %v2537_v50, 5  ;;  %v932_v58 = vrot.slane %v863_v46, 5  ;;  %v870_v60 = vrot.slane %v868_v54, 5  ;;  %v876_v61 = vrot.slane %v874_v49, 5 }
 0x36f   :  { %v878_v62 = vshrl.u32 %v859_v16, 16  ;;  %v926_v63 = vsel %vm2415_vm13, %v924_v53, %v925_v55  ;;  %v884_v2 = vshll.u32 %v862_v45, 16  ;;  %v889_v3 = vshrl.u32 %v860_v57, 16 }
 0x370   :  { %v931_v0 = vrot.slane %v929_v56, 4  ;;  %v1567_v4 = vcombine.low %v923_v14, %v926_v63  ;;  %v930_v5 = vsel %vm2415_vm13, %v1562_v51, %v929_v56  ;;  %v871_v6 = vor.u32 %v870_v60, %v867_v52 }
 0x371   :  { %v880_v8 = vrot.slane %v878_v62, 4  ;;  %v891_v10 = vrot.slane %v889_v3, 4  ;;  %v892_v12 = vshll.u32 %v860_v57, 16  ;;  %v898_v22 = vshll.u32 %v2537_v50, 16 }
 0x372   :  { %v933_v9 = vsel %vm2415_vm13, %v931_v0, %v932_v58  ;;  %1861 = vmatprep.mubr.bf16.mxu1 %v1567_v4  ;;  %v872_v25 = vrot.slane %v871_v6, 4  ;;  %v902_v28 = vshrl.u32 %v2537_v50, 16  ;;  %v886_v29 = vrot.slane %v884_v2, 5 }
 0x373   :  { %v1568_v23 = vcombine.low %v930_v5, %v933_v9  ;;  %v881_v26 = vor.u32 %v880_v8, %v876_v61  ;;  %v894_v32 = vrot.slane %v892_v12, 5  ;;  %v900_v33 = vrot.slane %v898_v22, 5 }
 0x374   :  { %v877_v36 = vsel %vm2422_vm14, %v872_v25, %v876_v61  ;;  %v904_v19 = vrot.slane %v902_v28, 4  ;;  %v908_v38 = vshll.u32 %v863_v46, 16  ;;  %v1564_v44 = vcombine.low %v860_v57, %v2537_v50 }
 0x375   :  { %1862 = vmatmul.mubr.bf16.vlgmr.msra.gmra.mrb[8].mxu1 %v1568_v23  ;;  %v882_v37 = vrot.slane %v881_v26, 4  ;;  %v895_v39 = vor.u32 %v894_v32, %v891_v10 }
 0x376   :  { %2009 = vmatpush3.bf16.msra.mxu1 %v2438_v1  ;;  %1932 = vmatprep.mubr.msk.f32.mxu1 %vm2258_vm15, %v2259_v35  ;;  %v905_v41 = vor.u32 %v904_v19, %v900_v33  ;;  %v910_v45 = vrot.slane %v908_v38, 5 }
 0x377   :  { %v887_v40 = vsel %vm2422_vm14, %v882_v37, %v886_v29  ;;  %2010 = vmatprep.subr.bf16.mxu1 %v2257_v59  ;;  %v896_v43 = vrot.slane %v895_v39, 4 }
 0x378   :  { %v1565_v42 = vcombine.low %v877_v36, %v887_v40  ;;  %v906_v15 = vrot.slane %v905_v41, 4 }
 0x379   :  { %v901_v18 = vsel %vm2422_vm14, %v896_v43, %v900_v33 }
 0x37a   :  { %1184 = vmatprep.mubr.bf16.mxu0 %v1565_v42  ;;  %2012 = vmatpush3.bf16.msra.mxu1 %v2448_v13  ;;  %v911_v47 = vsel %vm2422_vm14, %v906_v15, %v910_v45  ;;  %v158_v42 = vld [vmem:[%s2619_s3 + $0x2] sm:$0x1]  ;;  %v1603_v15 = vld [vmem:[#allocation3] sm:$0xff]  }
 0x37b   :  { %1185 = vmatmul.mubr.bf16.vlgmr.msra.gmra.mrb[12].mxu0 %v1563_v11  ;;  %2013 = vmatprep.subr.bf16.mxu1 %v2257_v59  ;;  %v1566_v20 = vcombine.low %v901_v18, %v911_v47  ;;  %v1610_v45 = vld [vmem:[#allocation3 + $0x8] sm:$0xff]  }
 0x37c   :  { %1985 = vmatpush3.bf16.msra.mxu0 %v2438_v1  ;;  %v1593_v47 = vld [vmem:[%s2619_s3 + $0x3] ss:$0 sm:$0xff]  ;;  %s2260_s3 = smov [#allocation11]  }
 0x37d   :  { %1986 = vmatprep.subr.bf16.mxu0 %v2257_v59  ;;  %1192 = vmatprep.mubr.bf16.mxu0 %v1566_v20  ;;  %v1604_v20 = vunpack.c.l.bf16 %v1603_v15  ;;  %s1506_s24 = sshll.u32 %s2260_s3, 4  ;;  %s1507_s24 = int_to_ptr.vmem [resolvable:$true] %s1506_s24 }
 0x37e   :  { %2015 = vmatpush3.bf16.msra.mxu1 %v2454_v17  ;;  %s2219_s25 = scalar_lea.vmem %s1507_s24, 512  ;;  %p2224_p5 = scmp.lt.s32.totalorder %s1507_s24, %s1507_s24 }
 0x37f   :  { %2016 = vmatprep.subr.bf16.mxu1 %v2257_v59  ;;  %p2220_p4 = scmp.ne.s32.totalorder %s1507_s24, %s2219_s25  ;;  %p2225_p6 = scmp.lt.s32.totalorder %s2219_s25, %s2219_s25 }
 0x380   :  { %1988 = vmatpush3.bf16.msra.mxu0 %v2448_v13 }
 0x381   :  { %1989 = vmatprep.subr.bf16.mxu0 %v2257_v59  ;;  %p2226_p7 = por %p2225_p6, %p2224_p5 }
 0x382   :  { %2018 = vmatpush3.bf16.msra.mxu1 %v2460_v21 }
 0x383   :  { %1193 = vmatmul.mubr.bf16.gmra.mrb[16].mxu0 %v1564_v44  ;;  %2019 = vmatprep.subr.bf16.mxu1 %v2257_v59  ;;  %v1605_v44 = vunpack.c.h.bf16 %v1603_v15  ;;  %p2227_p8 = pnand %p2226_p7, %p2220_p4 }
 0x384   :  { %1991 = vmatpush3.bf16.msra.mxu0 %v2454_v17  ;;  %1897 = vmatprep.mubr.msk.f32.mxu0 %vm2258_vm15, %v2259_v35 }
 0x385   :  { %1992 = vmatprep.subr.bf16.mxu0 %v2257_v59 }
 0x386   :  { %2021 = vmatpush3.bf16.msra.mxu1 %v2466_v24 }
 0x387   :  { %2022 = vmatprep.subr.bf16.mxu1 %v2257_v59 }
 0x388   :  { %1994 = vmatpush3.bf16.msra.mxu0 %v2460_v21 }
 0x389   :  { %1995 = vmatprep.subr.bf16.mxu0 %v2257_v59 }
 0x38a   :  { %2024 = vmatpush3.bf16.msra.mxu1 %v2472_v27 }
 0x38b   :  { %2025 = vmatprep.subr.bf16.mxu1 %v2257_v59 }
 0x38c   :  { %1997 = vmatpush3.bf16.msra.mxu0 %v2466_v24 }
 0x38d   :  { %1998 = vmatprep.subr.bf16.mxu0 %v2257_v59 }
 0x38e   :  { %2027 = vmatpush3.bf16.msra.mxu1 %v2478_v30 }
 0x38f   :  { %2028 = vmatprep.subr.bf16.mxu1 %v2257_v59 }
 0x390   :  { %2000 = vmatpush3.bf16.msra.mxu0 %v2472_v27 }
 0x391   :  { %2001 = vmatprep.subr.bf16.mxu0 %v2257_v59 }
 0x392   :  { %2030 = vmatpush3.bf16.msra.mxu1 %v2484_v34 }
 0x394   :  { %2003 = vmatpush3.bf16.msra.mxu0 %v2478_v30 }
 0x395   :  { %2004 = vmatprep.subr.bf16.mxu0 %v2257_v59 }
 0x398   :  { %2006 = vmatpush3.bf16.msra.mxu0 %v2484_v34 }
 0x448   :  { %v1863_v31 = vpop.f32.mrb[8].mxu1 }
 0x449   :  { %v1235_v1 = vpop.f32.mrb[9].mxu1 }
 0x44a   :  { %v1864_v13 = vpop.f32.mrb[10].mxu1 }
 0x44b   :  { %v1238_v17 = vpop.f32.mrb[11].mxu1 }
 0x44e   :  { %v1699_v21 = vpop.f32.mrb[12].mxu0 }
 0x44f   :  { %v1700_v24 = vpop.f32.mrb[13].mxu0 }
 0x450   :  { %v1701_v35 = vadd.f32 %v1700_v24, %v1699_v21  ;;  %v1702_v16 = vpop.f32.mrb[14].mxu0 }
 0x451   :  { %v1703_v48 = vpop.f32.mrb[15].mxu0 }
 0x452   :  { %v1236_v27 = vadd.f32 %v1701_v35, %v1235_v1  ;;  %v1704_v54 = vadd.f32 %v1703_v48, %v1702_v16  ;;  %v1609_v1 = vunpack.c.h.bf16 %v1610_v45 }
 0x454   :  { %v1239_v49 = vadd.f32 %v1704_v54, %v1238_v17 }
 0x456   :  { %v1705_v50 = vpop.f32.mrb[16].mxu0  ;;  %v1250_v59 = vadd.f32 %v1239_v49, %v1236_v27 }
 0x457   :  { %v1706_v46 = vpop.f32.mrb[17].mxu0 }
 0x458   :  { %v1707_v51 = vadd.f32 %v1706_v46, %v1705_v50  ;;  %v1708_v30 = vpop.f32.mrb[18].mxu0 }
 0x459   :  { %v1709_v52 = vpop.f32.mrb[19].mxu0 }
 0x45a   :  { %v1244_v14 = vadd.f32 %v1863_v31, %v1707_v51  ;;  %v1710_v34 = vadd.f32 %v1709_v52, %v1708_v30  ;;  %v1608_v31 = vunpack.c.l.bf16 %v1610_v45 }
 0x45c   :  { %v1251_v53 = vadd.f32 %v1250_v59, %v1244_v14  ;;  %v1247_v55 = vadd.f32 %v1864_v13, %v1710_v34 }
 0x45e   :  { %v1252_v56 = vadd.f32 %v1251_v53, %v1247_v55 }
 0x460   :  { %v1253_v57 = vrot.slane %v1252_v56, 4 }
 0x462   :  { %v1254_v58 = vadd.f32 %v1253_v57, %v1252_v56 }
 0x464   :  { %v1255_v60 = vrot.slane %v1254_v58, 2 }
 0x466   :  { %v1256_v61 = vadd.f32 %v1255_v60, %v1254_v58 }
 0x468   :  { %v1257_v62 = vrot.slane %v1256_v61, 1 }
 0x46a   :  { %v1258_v63 = vadd.f32 %v1257_v62, %v1256_v61 }
 0x46c   :  { %1898 = vmatmul.mubr.f32.vlgmr.msra.gmra.mrb[10].mxu0 %v1258_v63 }
 0x53f   :  { %v1341_v0 = vpop.f32.mrb[10].mxu0 }
 0x540   :  { %v1345_v2 = vmul.f32 0.001953125, %v1341_v0  ;;  %v1899_v3 = vpop.f32.mrb[11].mxu0 }
 0x542   :  { %v1349_v4 = vrot.slane %v1345_v2, %v2492_v7 }
 0x544   :  { %v1350_v5 = vsub.f32 %v1236_v27, %v1349_v4  ;;  %v1351_v6 = vsub.f32 %v1239_v49, %v1349_v4  ;;  %v1352_v8 = vsub.f32 %v1244_v14, %v1349_v4  ;;  %v1353_v9 = vsub.f32 %v1247_v55, %v1349_v4 }
 0x546   :  { %v1354_v10 = vmul.f32 %v1350_v5, %v1350_v5  ;;  %v1355_v12 = vmul.f32 %v1351_v6, %v1351_v6  ;;  %v1356_v22 = vmul.f32 %v1352_v8, %v1352_v8  ;;  %v1357_v25 = vmul.f32 %v1353_v9, %v1353_v9 }
 0x548   :  { %v1358_v23 = vadd.f32 %v1355_v12, %v1354_v10 }
 0x54a   :  { %v1359_v26 = vadd.f32 %v1358_v23, %v1356_v22 }
 0x54c   :  { %v1360_v28 = vadd.f32 %v1359_v26, %v1357_v25 }
 0x54e   :  { %v1361_v29 = vrot.slane %v1360_v28, 4 }
 0x550   :  { %v1362_v32 = vadd.f32 %v1361_v29, %v1360_v28 }
 0x552   :  { %v1363_v33 = vrot.slane %v1362_v32, 2 }
 0x554   :  { %v1364_v36 = vadd.f32 %v1363_v33, %v1362_v32 }
 0x556   :  { %v1365_v37 = vrot.slane %v1364_v36, 1 }
 0x558   :  { %v1366_v19 = vadd.f32 %v1365_v37, %v1364_v36 }
 0x55a   :  { %1933 = vmatmul.mubr.f32.vlgmr.msra.gmra.mrb[6].mxu1 %v1366_v19 }
 0x62d   :  { %v1433_v38 = vpop.f32.mrb[6].mxu1 }
 0x62e   :  { %v1437_v39 = vmul.f32 0.001953125, %v1433_v38  ;;  %v1934_v40 = vpop.f32.mrb[7].mxu1 }
 0x630   :  { %v1438_v41 = vadd.f32 1e-05, %v1437_v39 }
 0x632   :  { %2113 = vrsqrt.f32 %v1438_v41 }
 0x63c   :  { %v2114_v43 = vpop.eup %2113 }
 0x63d   :  { %v1440_v11 = vmul.f32 %v2114_v43, %v158_v42 }
 0x63f   :  { %v1444_v18 = vrot.slane %v1440_v11, %v2492_v7 }
 0x641   :  { %v1445_v13 = vmul.f32 %v1444_v18, %v1350_v5  ;;  %v1446_v17 = vmul.f32 %v1444_v18, %v1351_v6  ;;  %v1447_v21 = vmul.f32 %v1444_v18, %v1352_v8  ;;  %v1448_v24 = vmul.f32 %v1444_v18, %v1353_v9 }
 0x643   :  { %v1453_v35 = vadd.f32 %v1593_v47, %v1445_v13  ;;  %v1454_v16 = vadd.f32 %v1593_v47, %v1446_v17  ;;  %v1455_v48 = vadd.f32 %v1593_v47, %v1447_v21  ;;  %v1456_v27 = vadd.f32 %v1593_v47, %v1448_v24 }
 0x645   :  { %v1465_v54 = vadd.f32 %v1604_v20, %v1453_v35  ;;  %v1466_v49 = vadd.f32 %v1605_v44, %v1454_v16  ;;  %v1467_v50 = vadd.f32 %v1608_v31, %v1455_v48  ;;  %v1468_v7 = vadd.f32 %v1609_v1, %v1456_v27 }
 0x647   :  { %v1594_v46 = vmul.f32 -1.442695, %v1465_v54  ;;  %v1595_v51 = vmul.f32 -1.442695, %v1466_v49  ;;  %v1596_v30 = vmul.f32 -1.442695, %v1467_v50 }
 0x648   :  { %v1597_v52 = vmul.f32 -1.442695, %v1468_v7 }
 0x649   :  { %2115 = vpow2.f32 %v1594_v46 }
 0x64a   :  { %2117 = vpow2.f32 %v1595_v51 }
 0x64b   :  { %2119 = vpow2.f32 %v1596_v30 }
 0x64c   :  { %2121 = vpow2.f32 %v1597_v52 }
 0x653   :  { %v2116_v59 = vpop.eup %2115 }
 0x654   :  { %v2118_v14 = vpop.eup %2117  ;;  %v1481_v34 = vadd.f32 1.0, %v2116_v59 }
 0x655   :  { %v2120_v53 = vpop.eup %2119  ;;  %v1482_v55 = vadd.f32 1.0, %v2118_v14 }
 0x656   :  { %v2122_v56 = vpop.eup %2121  ;;  %v1483_v57 = vadd.f32 1.0, %v2120_v53  ;;  %2123 = vrcp.f32 %v1481_v34 }
 0x657   :  { %v1484_v58 = vadd.f32 1.0, %v2122_v56  ;;  %2125 = vrcp.f32 %v1482_v55 }
 0x658   :  { %2127 = vrcp.f32 %v1483_v57 }
 0x659   :  { %2129 = vrcp.f32 %v1484_v58 }
 0x660   :  { %v2124_v60 = vpop.eup %2123 }
 0x661   :  { %v2126_v61 = vpop.eup %2125  ;;  %v1493_v62 = vmul.f32 %v2124_v60, %v1465_v54 }
 0x662   :  { %v2128_v63 = vpop.eup %2127  ;;  %v1494_v0 = vmul.f32 %v2126_v61, %v1466_v49 }
 0x663   :  { %v2130_v2 = vpop.eup %2129  ;;  %v1495_v3 = vmul.f32 %v2128_v63, %v1467_v50  ;;  %1497 = vst [vmem:[#allocation11] sm:$0xff] %v1493_v62 }
 0x664   :  { %v1496_v4 = vmul.f32 %v2130_v2, %v1468_v7  ;;  %1498 = vst [vmem:[#allocation11 + $0x8] sm:$0xff] %v1494_v0 }
 0x665   :  { %1499 = vst [vmem:[#allocation11 + $0x10] sm:$0xff] %v1495_v3 }
 0x666   :  { %1500 = vst [vmem:[#allocation11 + $0x18] sm:$0xff] %v1496_v4 }
 0x667   :  { %2230 = shalt.err (!%p2227_p8)
}
 0x668   :  { %s2231_s28 = scalar_lea.hbm %s2621_s5, 512 }
 0x669   :  { %p2232_p9 = scmp.ne.s32.totalorder %s2621_s5, %s2231_s28  ;;  %p2235_p10 = scmp.lt.u32.totalorder %s2231_s28, %s2621_s5 }
 0x66b   :  { %p2237_p11 = pnand %p2235_p10, %p2232_p9 }
 0x66d   :  { %2240 = shalt.err (!%p2237_p11)
}
 0x66e   :  { %1512 = dma.vmem_to_hbm [thread:$0]  %s1507_s24, 512, %s2621_s5, [#allocation5], %s2255_s2, %s2255_s2, %s2256_s30  }
 0x66f   :  { %2247 = dma.done.wait [#allocation5], 512  }
 0x670   :  { %2248 = vsyncadd [#allocation5], 4294966784 }
 0x671   :  { %1516 = vsyncpa [#allocation4], 1 }
 0x672   :  { %1517 = vsyncpa [#allocation7], 1 }
 0x673   :  { %1518 = vsyncpa [#allocation10], 1 }
 0x674   :  { %1519 = vsyncpa [#allocation5], 1 }

</bundles_post_ra>
